<compile_context>
chip_gen: v7x
topology: tpu7x:2x2x1
jax: 0.10.0
libtpu: 0.0.40
codegen_flags: <defaults>
</compile_context>

<pallas_src>
import functools

import jax
import jax.numpy as jnp
from jax import lax
from jax.experimental import pallas as pl
from jax.experimental.pallas import tpu as pltpu


def _round_up(a, b):
    return (a + b - 1) // b * b


def _pick_spatial_tile(hw, cin, max_col_bytes=8 << 20):
    """Largest lane tile (multiple of 128 that divides hw, capped at 2048) whose
    bf16 im2col slab (9*cin, tile) stays under max_col_bytes.  Falls back to the
    whole image when hw has no suitable divisor."""
    if hw <= 128:
        return hw
    budget = max(128, (max_col_bytes // (9 * cin * 2)) // 128 * 128)
    t = min((hw // 128) * 128, budget, 2048)
    while t >= 128:
        if hw % t == 0:
            return t
        t -= 128
    return hw


def arm_kernel(x_ref, mask_ref, w1_ref, b1_ref, w2_ref, b2_ref, o_ref,
               xpad_ref, col_ref, *, W, PAD, T):
    # x_ref    : (Cin,  H*W)          bf16  one batch element, spatial flattened (NCHW)
    # mask_ref : (2,    H*W)          bf16  [0]: (w != 0) for dw=-1, [1]: (w != W-1) for dw=+1
    # w1_ref   : (Cout, 9*Cin)        bf16  folded conv*BN 3x3 weights, K = (kh, kw, cin)-major
    # b1_ref   : (Cout, 1)            f32   folded conv/BN bias
    # w2_ref   : (Cout, Cout)         f32   1x1 "linear" conv weight (out, in)
    # b2_ref   : (Cout, 1)            f32
    # o_ref    : (Cout, H*W)          f32   lane-dense output block (resident, rescaled in place)
    # xpad_ref : (Cin,  H*W + 2*PAD)  bf16  VMEM scratch: zero-padded flat input
    # col_ref  : (9*Cin, T)           bf16  VMEM scratch: im2col slab for one lane tile
    Cin, HW = x_ref.shape
    Cout = o_ref.shape[0]
    n_tiles = HW // T

    # --- zero ONLY the halo strips (interior is fully overwritten below).  Done every
    # grid step: scratch is per-core and uninitialized, and a program_id==0 guard would
    # be wrong when the batch axis is sharded across TensorCores.  Cost is tiny.
    zeros_strip = jnp.zeros((Cin, PAD), xpad_ref.dtype)
    xpad_ref[:, :PAD] = zeros_strip
    xpad_ref[:, PAD + HW:PAD + HW + PAD] = zeros_strip

    # --- in-kernel padding: lane-aligned store of the flattened bf16 image -----------
    xpad_ref[:, PAD:PAD + HW] = x_ref[...]

    taps = [(dh, dw) for dh in (-1, 0, 1) for dw in (-1, 0, 1)]
    pooled = jnp.zeros((Cout, 1), jnp.float32)

    # --- static spatial tile loop: build (9*Cin, T) im2col slab, one fused MXU matmul
    # per tile, ReLU, write straight into the resident output block, partial pool.
    for ti in range(n_tiles):
        base = PAD + ti * T
        # Hoisted W-edge masks for this tile (JAX does not CSE the broadcast).
        m_left = mask_ref[0:1, ti * T:(ti + 1) * T]   # (w != 0)     for dw = -1
        m_right = mask_ref[1:2, ti * T:(ti + 1) * T]  # (w != W - 1) for dw = +1

        for k, (dh, dw) in enumerate(taps):
            start = base + dh * W + dw                # static offset, always >= 0
            patch = xpad_ref[:, start:start + T]      # (Cin, T) bf16
            if dw == -1:
                patch = patch * m_left
            elif dw == 1:
                patch = patch * m_right
            col_ref[k * Cin:(k + 1) * Cin, :] = patch  # bf16 store (no cast pass later)

        # fused 3x3 conv: bf16 inputs, f32 accumulation; conv/BN bias + ReLU.
        acc = jnp.dot(w1_ref[...], col_ref[...],
                      preferred_element_type=jnp.float32)       # (Cout, T) f32
        net = jnp.maximum(acc + b1_ref[...], 0.0)
        o_ref[:, ti * T:(ti + 1) * T] = net

        # partial AdaptiveAvgPool2d(1): lane-axis reduction of this tile.
        pooled = pooled + jnp.sum(net, axis=1, keepdims=True)

    pooled = pooled * (1.0 / HW)                                # (Cout, 1)

    # --- 1x1 conv ("linear") + sigmoid -> per-channel attention -----------------------
    attn = jax.nn.sigmoid(
        jnp.dot(w2_ref[...], pooled, preferred_element_type=jnp.float32)
        + b2_ref[...])                                          # (Cout, 1)

    # --- in-place re-weighting of the resident output block (lane-dense store) --------
    o_ref[...] = o_ref[...] * attn


@jax.jit
def arm_forward(x_nchw, w1_hwio, b1, w2_oi, b2):
    """x_nchw: (N, Cin, H, W) -> (N, Cout, H, W), matching torch semantics.

    w1_hwio: (3, 3, Cin, Cout) folded conv*BN weight (HWIO).
    w2_oi  : (Cout, Cout) 1x1 conv weight in torch (out, in) layout.
    """
    N, Cin, H, W = x_nchw.shape
    Cout = w1_hwio.shape[-1]
    HW = H * W

    PAD = max(128, _round_up(W + 1, 128))     # lane halo; must cover one image row + 1
    assert PAD >= W + 1 and PAD % 128 == 0
    T = _pick_spatial_tile(HW, Cin)
    assert HW % T == 0

    # Free, view-like reshape of contiguous NCHW; bf16 halves input HBM traffic
    # (matmul already runs in bf16; bias/ReLU/pool/sigmoid stay f32).
    x2d = x_nchw.reshape(N, Cin, HW).astype(jnp.bfloat16)

    # W-edge masks (kill flat-index wraparound at left/right image borders).
    w_pos = jnp.arange(HW, dtype=jnp.int32) % W
    mask = jnp.stack([(w_pos != 0), (w_pos != W - 1)]).astype(jnp.bfloat16)   # (2, HW)

    # Weights / biases in kernel layout.
    w1_2d = w1_hwio.reshape(9 * Cin, Cout).T.astype(jnp.bfloat16)   # (Cout, 9*Cin)
    b1_2d = b1.reshape(Cout, 1).astype(jnp.float32)
    w2_2d = w2_oi.astype(jnp.float32)                               # (Cout, Cout) (out,in)
    b2_2d = b2.reshape(Cout, 1).astype(jnp.float32)

    kernel = functools.partial(arm_kernel, W=W, PAD=PAD, T=T)

    # Explicit VMEM budget: double-buffered ins/outs + scratch, with ~40% headroom.
    need = (2 * Cin * HW * 2                      # x (bf16), double-buffered
            + 2 * 2 * HW * 2                      # masks (bf16)
            + 2 * Cout * 9 * Cin * 2              # w1 (bf16)
            + 2 * Cout * max(Cout, 128) * 4       # w2 (lane-padded)
            + 4 * Cout * 128 * 4                  # b1, b2 (lane-padded)
            + 2 * Cout * HW * 4                   # output block (f32), double-buffered
            + Cin * (HW + 2 * PAD) * 2            # padded-image scratch (bf16)
            + 9 * Cin * T * 2)                    # im2col scratch (bf16)
    vmem_limit = min(100 * 1024 * 1024, max(32 * 1024 * 1024, int(need * 1.4)))

    out2d = pl.pallas_call(
        kernel,
        out_shape=jax.ShapeDtypeStruct((N, Cout, HW), jnp.float32),
        grid=(N,),
        in_specs=[
            pl.BlockSpec((None, Cin, HW), lambda n: (n, 0, 0)),
            pl.BlockSpec((2, HW), lambda n: (0, 0)),
            pl.BlockSpec((Cout, 9 * Cin), lambda n: (0, 0)),
            pl.BlockSpec((Cout, 1), lambda n: (0, 0)),
            pl.BlockSpec((Cout, Cout), lambda n: (0, 0)),
            pl.BlockSpec((Cout, 1), lambda n: (0, 0)),
        ],
        out_specs=pl.BlockSpec((None, Cout, HW), lambda n: (n, 0, 0)),
        scratch_shapes=[
            pltpu.VMEM((Cin, HW + 2 * PAD), jnp.bfloat16),   # padded flat input
            pltpu.VMEM((9 * Cin, T), jnp.bfloat16),          # per-tile im2col slab
        ],
        compiler_params=pltpu.CompilerParams(
            dimension_semantics=("parallel",),
            vmem_limit_bytes=vmem_limit),
    )(x2d, mask, w1_2d, b1_2d, w2_2d, b2_2d)

    return out2d.reshape(N, Cout, H, W)


def arm_reference(x_nchw, w1_hwio, b1, w2_oi, b2):
    """Pure-JAX reference of the same forward pass (for correctness check)."""
    x = jnp.transpose(x_nchw, (0, 2, 3, 1))
    net = lax.conv_general_dilated(
        x, w1_hwio, window_strides=(1, 1), padding=((1, 1), (1, 1)),
        dimension_numbers=('NHWC', 'HWIO', 'NHWC'))
    net = jnp.maximum(net + b1[None, None, None, :], 0.0)
    pooled = jnp.mean(net, axis=(1, 2))                        # (N, Cout)
    attn = jax.nn.sigmoid(pooled @ w2_oi.T + b2[None, :])      # torch 1x1 conv: y = W x + b
    out = net * attn[:, None, None, :]
    return jnp.transpose(out, (0, 3, 1, 2))


if __name__ == "__main__":
    N, Cin, Cout, H, W = 2, 4, 8, 16, 16

    key = jax.random.PRNGKey(0)
    ks = jax.random.split(key, 8)
    x = jax.random.normal(ks[0], (N, Cin, H, W), jnp.float32)

    # Deterministic synthetic parameters (conv, BN running stats, 1x1 conv).
    w_conv = jax.random.normal(ks[1], (3, 3, Cin, Cout), jnp.float32) * 0.2  # HWIO
    b_conv = jax.random.normal(ks[2], (Cout,), jnp.float32) * 0.1
    gamma = 1.0 + 0.1 * jax.random.normal(ks[3], (Cout,), jnp.float32)
    beta = 0.1 * jax.random.normal(ks[4], (Cout,), jnp.float32)
    run_mean = 0.1 * jax.random.normal(ks[5], (Cout,), jnp.float32)
    run_var = jnp.abs(1.0 + 0.1 * jax.random.normal(ks[6], (Cout,), jnp.float32))
    w_lin = jax.random.normal(ks[7], (Cout, Cout), jnp.float32) * 0.2        # (out, in)
    b_lin = jnp.linspace(-0.1, 0.1, Cout, dtype=jnp.float32)

    # Fold BatchNorm (eval mode) into the 3x3 conv.
    inv_std = gamma / jnp.sqrt(run_var + 1e-5)
    w1 = w_conv * inv_std[None, None, None, :]
    b1 = beta + (b_conv - run_mean) * inv_std

    out = arm_forward(x, w1, b1, w_lin, b_lin)
    out = jax.block_until_ready(out)

    ref = arm_reference(x, w1, b1, w_lin, b_lin)
    assert out.shape == (N, Cout, H, W), out.shape
    max_err = float(jnp.max(jnp.abs(out - ref)))
    # bf16 matmul inputs -> loosened tolerance (f32 accumulation keeps it tight).
    assert jnp.allclose(out, ref, rtol=5e-2, atol=5e-2), max_err

    print("KERNEL_OK")
</pallas_src>

<mosaic_0001>
module attributes {stable_mosaic.version = 11 : i64} {
  func.func @arm_kernel(%arg0: i32, %arg1: memref<1x4x256xbf16, #tpu.memory_space<vmem>>, %arg2: memref<2x256xbf16, #tpu.memory_space<vmem>>, %arg3: memref<8x36xbf16, #tpu.memory_space<vmem>>, %arg4: memref<8x1xf32, #tpu.memory_space<vmem>>, %arg5: memref<8x8xf32, #tpu.memory_space<vmem>>, %arg6: memref<8x1xf32, #tpu.memory_space<vmem>>, %arg7: memref<1x8x256xf32, #tpu.memory_space<vmem>>, %arg8: memref<4x512xbf16, #tpu.memory_space<vmem>>, %arg9: memref<36x256xbf16, #tpu.memory_space<vmem>>) attributes {dimension_semantics = [#tpu.dimension_semantics<parallel>], iteration_bounds = array<i64: 2>, scalar_prefetch = 0 : i64, scratch_operands = 2 : i64, tpu.core_type = #tpu.core_type<tc>, window_params = [{transform_indices = @transform_0, window_bounds = array<i64: 1, 4, 256>}, {pipeline_mode = #tpu.pipeline_mode<synchronous>, transform_indices = @transform_1, window_bounds = array<i64: 2, 256>}, {pipeline_mode = #tpu.pipeline_mode<synchronous>, transform_indices = @transform_2, window_bounds = array<i64: 8, 36>}, {pipeline_mode = #tpu.pipeline_mode<synchronous>, transform_indices = @transform_3, window_bounds = array<i64: 8, 1>}, {pipeline_mode = #tpu.pipeline_mode<synchronous>, transform_indices = @transform_4, window_bounds = array<i64: 8, 8>}, {pipeline_mode = #tpu.pipeline_mode<synchronous>, transform_indices = @transform_5, window_bounds = array<i64: 8, 1>}, {transform_indices = @transform_6, window_bounds = array<i64: 1, 8, 256>}]} {
    %cst = arith.constant 0.000000e+00 : bf16
    %0 = vector.broadcast %cst : bf16 to vector<4x128xbf16>
    %c0 = arith.constant 0 : index
    %c0_0 = arith.constant 0 : index
    %1 = vector.load %arg8[%c0, %c0_0] : memref<4x512xbf16, #tpu.memory_space<vmem>>, vector<4x128xbf16>
    tpu.vector_store %arg8[%c0, %c0_0], %0 {strides = array<i32>} : memref<4x512xbf16, #tpu.memory_space<vmem>>, vector<4x128xbf16>,
    %c0_1 = arith.constant 0 : index
    %c384 = arith.constant 384 : index
    %2 = vector.load %arg8[%c0_1, %c384] : memref<4x512xbf16, #tpu.memory_space<vmem>>, vector<4x128xbf16>
    tpu.vector_store %arg8[%c0_1, %c384], %0 {strides = array<i32>} : memref<4x512xbf16, #tpu.memory_space<vmem>>, vector<4x128xbf16>,
    %c0_2 = arith.constant 0 : index
    %c0_3 = arith.constant 0 : index
    %c0_4 = arith.constant 0 : index
    %3 = vector.load %arg1[%c0_2, %c0_3, %c0_4] : memref<1x4x256xbf16, #tpu.memory_space<vmem>>, vector<1x4x256xbf16>
    %4 = vector.shape_cast %3 : vector<1x4x256xbf16> to vector<4x256xbf16>
    %c0_5 = arith.constant 0 : index
    %c128 = arith.constant 128 : index
    %5 = vector.load %arg8[%c0_5, %c128] : memref<4x512xbf16, #tpu.memory_space<vmem>>, vector<4x256xbf16>
    tpu.vector_store %arg8[%c0_5, %c128], %4 {strides = array<i32>} : memref<4x512xbf16, #tpu.memory_space<vmem>>, vector<4x256xbf16>,
    %cst_6 = arith.constant 0.000000e+00 : f32
    %6 = vector.broadcast %cst_6 : f32 to vector<8x1xf32>
    %c0_7 = arith.constant 0 : index
    %c0_8 = arith.constant 0 : index
    %7 = vector.load %arg2[%c0_7, %c0_8] : memref<2x256xbf16, #tpu.memory_space<vmem>>, vector<1x256xbf16>
    %c1 = arith.constant 1 : index
    %c0_9 = arith.constant 0 : index
    %8 = vector.load %arg2[%c1, %c0_9] : memref<2x256xbf16, #tpu.memory_space<vmem>>, vector<1x256xbf16>
    %c0_10 = arith.constant 0 : index
    %c111 = arith.constant 111 : index
    %9 = vector.load %arg8[%c0_10, %c111] : memref<4x512xbf16, #tpu.memory_space<vmem>>, vector<4x256xbf16>
    %10 = vector.broadcast %7 : vector<1x256xbf16> to vector<4x256xbf16>
    %11 = arith.mulf %9, %10 : vector<4x256xbf16>
    %c0_11 = arith.constant 0 : index
    %c0_12 = arith.constant 0 : index
    %12 = vector.load %arg9[%c0_11, %c0_12] : memref<36x256xbf16, #tpu.memory_space<vmem>>, vector<4x256xbf16>
    tpu.vector_store %arg9[%c0_11, %c0_12], %11 {strides = array<i32>} : memref<36x256xbf16, #tpu.memory_space<vmem>>, vector<4x256xbf16>,
    %c0_13 = arith.constant 0 : index
    %c112 = arith.constant 112 : index
    %13 = vector.load %arg8[%c0_13, %c112] : memref<4x512xbf16, #tpu.memory_space<vmem>>, vector<4x256xbf16>
    %c4 = arith.constant 4 : index
    %c0_14 = arith.constant 0 : index
    %14 = vector.load %arg9[%c4, %c0_14] : memref<36x256xbf16, #tpu.memory_space<vmem>>, vector<4x256xbf16>
    tpu.vector_store %arg9[%c4, %c0_14], %13 {strides = array<i32>} : memref<36x256xbf16, #tpu.memory_space<vmem>>, vector<4x256xbf16>,
    %c0_15 = arith.constant 0 : index
    %c113 = arith.constant 113 : index
    %15 = vector.load %arg8[%c0_15, %c113] : memref<4x512xbf16, #tpu.memory_space<vmem>>, vector<4x256xbf16>
    %16 = vector.broadcast %8 : vector<1x256xbf16> to vector<4x256xbf16>
    %17 = arith.mulf %15, %16 : vector<4x256xbf16>
    %c8 = arith.constant 8 : index
    %c0_16 = arith.constant 0 : index
    %18 = vector.load %arg9[%c8, %c0_16] : memref<36x256xbf16, #tpu.memory_space<vmem>>, vector<4x256xbf16>
    tpu.vector_store %arg9[%c8, %c0_16], %17 {strides = array<i32>} : memref<36x256xbf16, #tpu.memory_space<vmem>>, vector<4x256xbf16>,
    %c0_17 = arith.constant 0 : index
    %c127 = arith.constant 127 : index
    %19 = vector.load %arg8[%c0_17, %c127] : memref<4x512xbf16, #tpu.memory_space<vmem>>, vector<4x256xbf16>
    %20 = vector.broadcast %7 : vector<1x256xbf16> to vector<4x256xbf16>
    %21 = arith.mulf %19, %20 : vector<4x256xbf16>
    %c12 = arith.constant 12 : index
    %c0_18 = arith.constant 0 : index
    %22 = vector.load %arg9[%c12, %c0_18] : memref<36x256xbf16, #tpu.memory_space<vmem>>, vector<4x256xbf16>
    tpu.vector_store %arg9[%c12, %c0_18], %21 {strides = array<i32>} : memref<36x256xbf16, #tpu.memory_space<vmem>>, vector<4x256xbf16>,
    %c0_19 = arith.constant 0 : index
    %c128_20 = arith.constant 128 : index
    %23 = vector.load %arg8[%c0_19, %c128_20] : memref<4x512xbf16, #tpu.memory_space<vmem>>, vector<4x256xbf16>
    %c16 = arith.constant 16 : index
    %c0_21 = arith.constant 0 : index
    %24 = vector.load %arg9[%c16, %c0_21] : memref<36x256xbf16, #tpu.memory_space<vmem>>, vector<4x256xbf16>
    tpu.vector_store %arg9[%c16, %c0_21], %23 {strides = array<i32>} : memref<36x256xbf16, #tpu.memory_space<vmem>>, vector<4x256xbf16>,
    %c0_22 = arith.constant 0 : index
    %c129 = arith.constant 129 : index
    %25 = vector.load %arg8[%c0_22, %c129] : memref<4x512xbf16, #tpu.memory_space<vmem>>, vector<4x256xbf16>
    %26 = vector.broadcast %8 : vector<1x256xbf16> to vector<4x256xbf16>
    %27 = arith.mulf %25, %26 : vector<4x256xbf16>
    %c20 = arith.constant 20 : index
    %c0_23 = arith.constant 0 : index
    %28 = vector.load %arg9[%c20, %c0_23] : memref<36x256xbf16, #tpu.memory_space<vmem>>, vector<4x256xbf16>
    tpu.vector_store %arg9[%c20, %c0_23], %27 {strides = array<i32>} : memref<36x256xbf16, #tpu.memory_space<vmem>>, vector<4x256xbf16>,
    %c0_24 = arith.constant 0 : index
    %c143 = arith.constant 143 : index
    %29 = vector.load %arg8[%c0_24, %c143] : memref<4x512xbf16, #tpu.memory_space<vmem>>, vector<4x256xbf16>
    %30 = vector.broadcast %7 : vector<1x256xbf16> to vector<4x256xbf16>
    %31 = arith.mulf %29, %30 : vector<4x256xbf16>
    %c24 = arith.constant 24 : index
    %c0_25 = arith.constant 0 : index
    %32 = vector.load %arg9[%c24, %c0_25] : memref<36x256xbf16, #tpu.memory_space<vmem>>, vector<4x256xbf16>
    tpu.vector_store %arg9[%c24, %c0_25], %31 {strides = array<i32>} : memref<36x256xbf16, #tpu.memory_space<vmem>>, vector<4x256xbf16>,
    %c0_26 = arith.constant 0 : index
    %c144 = arith.constant 144 : index
    %33 = vector.load %arg8[%c0_26, %c144] : memref<4x512xbf16, #tpu.memory_space<vmem>>, vector<4x256xbf16>
    %c28 = arith.constant 28 : index
    %c0_27 = arith.constant 0 : index
    %34 = vector.load %arg9[%c28, %c0_27] : memref<36x256xbf16, #tpu.memory_space<vmem>>, vector<4x256xbf16>
    tpu.vector_store %arg9[%c28, %c0_27], %33 {strides = array<i32>} : memref<36x256xbf16, #tpu.memory_space<vmem>>, vector<4x256xbf16>,
    %c0_28 = arith.constant 0 : index
    %c145 = arith.constant 145 : index
    %35 = vector.load %arg8[%c0_28, %c145] : memref<4x512xbf16, #tpu.memory_space<vmem>>, vector<4x256xbf16>
    %36 = vector.broadcast %8 : vector<1x256xbf16> to vector<4x256xbf16>
    %37 = arith.mulf %35, %36 : vector<4x256xbf16>
    %c32 = arith.constant 32 : index
    %c0_29 = arith.constant 0 : index
    %38 = vector.load %arg9[%c32, %c0_29] : memref<36x256xbf16, #tpu.memory_space<vmem>>, vector<4x256xbf16>
    tpu.vector_store %arg9[%c32, %c0_29], %37 {strides = array<i32>} : memref<36x256xbf16, #tpu.memory_space<vmem>>, vector<4x256xbf16>,
    %c0_30 = arith.constant 0 : index
    %c0_31 = arith.constant 0 : index
    %39 = vector.load %arg3[%c0_30, %c0_31] : memref<8x36xbf16, #tpu.memory_space<vmem>>, vector<8x36xbf16>
    %c0_32 = arith.constant 0 : index
    %c0_33 = arith.constant 0 : index
    %40 = vector.load %arg9[%c0_32, %c0_33] : memref<36x256xbf16, #tpu.memory_space<vmem>>, vector<36x256xbf16>
    %cst_34 = arith.constant dense<0.000000e+00> : vector<8x256xf32>
    %41 = tpu.matmul %39, %40, %cst_34 {dimension_numbers = #tpu.dot_dimension_numbers<[1], [0], [0], [1], [0, 0, 1, 1], [], []>} : vector<8x36xbf16>, vector<36x256xbf16>, vector<8x256xf32> -> vector<8x256xf32>
    %c0_35 = arith.constant 0 : index
    %c0_36 = arith.constant 0 : index
    %42 = vector.load %arg4[%c0_35, %c0_36] : memref<8x1xf32, #tpu.memory_space<vmem>>, vector<8x1xf32>
    %43 = vector.broadcast %42 : vector<8x1xf32> to vector<8x256xf32>
    %44 = arith.addf %41, %43 : vector<8x256xf32>
    %cst_37 = arith.constant 0.000000e+00 : f32
    %45 = vector.broadcast %cst_37 : f32 to vector<8x256xf32>
    %46 = arith.maximumf %44, %45 : vector<8x256xf32>
    %c0_38 = arith.constant 0 : index
    %c0_39 = arith.constant 0 : index
    %c0_40 = arith.constant 0 : index
    %47 = vector.load %arg7[%c0_38, %c0_39, %c0_40] : memref<1x8x256xf32, #tpu.memory_space<vmem>>, vector<1x8x256xf32>
    %48 = vector.shape_cast %47 : vector<1x8x256xf32> to vector<8x256xf32>
    %49 = vector.shape_cast %46 : vector<8x256xf32> to vector<1x8x256xf32>
    tpu.vector_store %arg7[%c0_38, %c0_39, %c0_40], %49 {strides = array<i32>} : memref<1x8x256xf32, #tpu.memory_space<vmem>>, vector<1x8x256xf32>,
    %cst_41 = arith.constant dense<0.000000e+00> : vector<8xf32>
    %50 = vector.multi_reduction <add>, %46, %cst_41 [1] : vector<8x256xf32> to vector<8xf32>
    %51 = vector.shape_cast %50 : vector<8xf32> to vector<8x1xf32>
    %52 = arith.addf %6, %51 : vector<8x1xf32>
    %cst_42 = arith.constant 3.906250e-03 : f32
    %53 = vector.broadcast %cst_42 : f32 to vector<8x1xf32>
    %54 = arith.mulf %52, %53 : vector<8x1xf32>
    %c0_43 = arith.constant 0 : index
    %c0_44 = arith.constant 0 : index
    %55 = vector.load %arg5[%c0_43, %c0_44] : memref<8x8xf32, #tpu.memory_space<vmem>>, vector<8x8xf32>
    %cst_45 = arith.constant dense<0.000000e+00> : vector<8x1xf32>
    %56 = tpu.matmul %55, %54, %cst_45 {dimension_numbers = #tpu.dot_dimension_numbers<[1], [0], [0], [1], [0, 0, 1, 1], [], []>} : vector<8x8xf32>, vector<8x1xf32>, vector<8x1xf32> -> vector<8x1xf32>
    %c0_46 = arith.constant 0 : index
    %c0_47 = arith.constant 0 : index
    %57 = vector.load %arg6[%c0_46, %c0_47] : memref<8x1xf32, #tpu.memory_space<vmem>>, vector<8x1xf32>
    %58 = arith.addf %56, %57 : vector<8x1xf32>
    %59 = arith.negf %58 : vector<8x1xf32>
    %60 = math.exp %59 : vector<8x1xf32>
    %cst_48 = arith.constant 1.000000e+00 : f32
    %61 = vector.broadcast %cst_48 : f32 to vector<8x1xf32>
    %62 = arith.addf %61, %60 : vector<8x1xf32>
    %63 = arith.divf %61, %62 : vector<8x1xf32>
    %c0_49 = arith.constant 0 : index
    %c0_50 = arith.constant 0 : index
    %c0_51 = arith.constant 0 : index
    %64 = vector.load %arg7[%c0_49, %c0_50, %c0_51] : memref<1x8x256xf32, #tpu.memory_space<vmem>>, vector<1x8x256xf32>
    %65 = vector.shape_cast %64 : vector<1x8x256xf32> to vector<8x256xf32>
    %66 = vector.broadcast %63 : vector<8x1xf32> to vector<8x256xf32>
    %67 = arith.mulf %65, %66 : vector<8x256xf32>
    %c0_52 = arith.constant 0 : index
    %c0_53 = arith.constant 0 : index
    %c0_54 = arith.constant 0 : index
    %68 = vector.load %arg7[%c0_52, %c0_53, %c0_54] : memref<1x8x256xf32, #tpu.memory_space<vmem>>, vector<1x8x256xf32>
    %69 = vector.shape_cast %68 : vector<1x8x256xf32> to vector<8x256xf32>
    %70 = vector.shape_cast %67 : vector<8x256xf32> to vector<1x8x256xf32>
    tpu.vector_store %arg7[%c0_52, %c0_53, %c0_54], %70 {strides = array<i32>} : memref<1x8x256xf32, #tpu.memory_space<vmem>>, vector<1x8x256xf32>,
    return
  }
  func.func @transform_0(%arg0: i32) -> (i32, i32, i32) {
    %c0_i32 = arith.constant 0 : i32
    %c0_i32_0 = arith.constant 0 : i32
    %c0_i32_1 = arith.constant 0 : i32
    return %arg0, %c0_i32, %c0_i32_0 : i32, i32, i32
  }
  func.func @transform_1(%arg0: i32) -> (i32, i32) {
    %c0_i32 = arith.constant 0 : i32
    %c0_i32_0 = arith.constant 0 : i32
    %c0_i32_1 = arith.constant 0 : i32
    return %c0_i32, %c0_i32_0 : i32, i32
  }
  func.func @transform_2(%arg0: i32) -> (i32, i32) {
    %c0_i32 = arith.constant 0 : i32
    %c0_i32_0 = arith.constant 0 : i32
    %c0_i32_1 = arith.constant 0 : i32
    return %c0_i32, %c0_i32_0 : i32, i32
  }
  func.func @transform_3(%arg0: i32) -> (i32, i32) {
    %c0_i32 = arith.constant 0 : i32
    %c0_i32_0 = arith.constant 0 : i32
    %c0_i32_1 = arith.constant 0 : i32
    return %c0_i32, %c0_i32_0 : i32, i32
  }
  func.func @transform_4(%arg0: i32) -> (i32, i32) {
    %c0_i32 = arith.constant 0 : i32
    %c0_i32_0 = arith.constant 0 : i32
    %c0_i32_1 = arith.constant 0 : i32
    return %c0_i32, %c0_i32_0 : i32, i32
  }
  func.func @transform_5(%arg0: i32) -> (i32, i32) {
    %c0_i32 = arith.constant 0 : i32
    %c0_i32_0 = arith.constant 0 : i32
    %c0_i32_1 = arith.constant 0 : i32
    return %c0_i32, %c0_i32_0 : i32, i32
  }
  func.func @transform_6(%arg0: i32) -> (i32, i32, i32) {
    %c0_i32 = arith.constant 0 : i32
    %c0_i32_0 = arith.constant 0 : i32
    %c0_i32_1 = arith.constant 0 : i32
    return %arg0, %c0_i32, %c0_i32_0 : i32, i32, i32
  }
}

</mosaic_0001>

<bundles_post_ra>
// kernel: arm_forward.1
= control target key start
LH: loop header
LB: loop body
LE: loop exit
PB: predicated region body
PF: predicated region fallthrough
CT: control target
= control target key end

     0   :  { %s971_s21 = smov 0   ;;  %s1072_s0 = inlined_call_operand.vmem [shape: bf16[2,4,256], index: 0, kind: input, shape index: {}]   ;;  %s1073_s1 = inlined_call_operand.vmem [shape: bf16[2,256], index: 1, kind: input, shape index: {}]   ;;  %s1074_s2 = inlined_call_operand.vmem [shape: bf16[8,36], index: 2, kind: input, shape index: {}]   ;;  %s1075_s3 = inlined_call_operand.vmem [shape: f32[8,1], index: 3, kind: input, shape index: {}]   ;;  %s1076_s4 = inlined_call_operand.vmem [shape: f32[8,8], index: 4, kind: input, shape index: {}]   ;;  %s1077_s5 = inlined_call_operand.vmem [shape: f32[8,1], index: 5, kind: input, shape index: {}]   ;;  %s1078_s6 = inlined_call_operand.vmem [shape: f32[2,8,256], index: 6, kind: output, shape index: {}]  }
   0x1 LB: > { %s847_s22 = sadd.s32 4294967295, %s921_s21   ;;  %p851_p0 = scmp.ge.s32.totalorder %s921_s21, 1  ;;  %s921_s21 = sphi %s971_s21, %s16_s21  }
   0x2   : > { %p212_p1 = scmp.lt.s32.totalorder %s921_s21, 3 }
   0x4   : > { %p213_p2 = pnand %p851_p0, %p212_p1 }
   0x5   : > { %v856_v0 = vld.sshfl [vmem:[%s1073_s1] sm:$0x11 pattern:$0x75316420] (!%p213_p2)  ;;  %v271_v1 = vlaneseq (!%p213_p2)  ;;  %v923_v2 = vmov (!%p213_p2), 1966171168  }
   0x6   : > { %216 = sbr.rel (%p213_p2) target bundleno = 1036 (0x40c), region = 44  ;;  %v269_v3 = vunpack.c.l.s4 (!%p213_p2), %v923_v2  ;;  %v924_v5 = vmov (!%p213_p2), 1983009808   ;;  %v267_v7 = vcombine.high (!%p213_p2), %v856_v0, %v856_v0  ;;  %v925_v9 = vmov (!%p213_p2), 0   ;;  %p242_p3 = scmp.lt.s32.totalorder (!%p213_p2), %s847_s22, 1 }
   0x7   : > { %v272_v4 = vshrl.u32 (!%p213_p2), %v271_v1, 7  ;;  %v300_v6 = vunpack.c.l.s4 (!%p213_p2), %v924_v5  ;;  %253 = vst [vmem:[#allocation2] sm:$0x3] (!%p213_p2), %v925_v9  ;;  %254 = vst [vmem:[#allocation2 + $0x6] sm:$0x3] (!%p213_p2), %v925_v9  ;;  %681 = vmatprep.mubr.bf16.mxu0 (!%p213_p2), %v925_v9  ;;  %900 = vset.pattern.permute.xlu0 (!%p213_p2), %v925_v9  ;;  %s926_s29 = smov (!%p213_p2), 127  }
   0x8   : > { %v270_v8 = vunpack.c.0.s8 (!%p213_p2), %v269_v3  ;;  %s927_s30 = smov (!%p213_p2), 111   ;;  %s928_s7 = smov (!%p213_p2), 113   ;;  %vm432_vm0 = vcmask (!%p213_p2), 1039360   ;;  %vm309_vm1 = vcmask (!%p213_p2), 908288   ;;  %vm459_vm2 = vcmask (!%p213_p2), 7168  }
   0x9   : > { %v301_v11 = vunpack.c.0.s8 (!%p213_p2), %v300_v6  ;;  %v287_v14 = vsub.s32 (!%p213_p2), 0, %v272_v4  ;;  %s929_s8 = smov (!%p213_p2), 1   ;;  %s930_s9 = smov (!%p213_p2), 15   ;;  %vm397_vm3 = vcmask (!%p213_p2), 924672   ;;  %vm424_vm4 = vcmask (!%p213_p2), 121856  }
   0xa   : > { %v273_v10 = vsub.s32 (!%p213_p2), %v270_v8, %v272_v4  ;;  %s931_s10 = smov (!%p213_p2), 17   ;;  %s932_s11 = smov (!%p213_p2), 16   ;;  %vm335_vm5 = vcmask (!%p213_p2), 1043456   ;;  %vm365_vm6 = vcmask (!%p213_p2), 130048   ;;  %vm337_vm7 = vcmask (!%p213_p2), 138240  }
   0xb   : > { %v988_v19 = vsub.s32 (!%p213_p2), %v301_v11, %v272_v4  ;;  %s933_s12 = smov (!%p213_p2), 112   ;;  %vm564_vm8 = vcmask (!%p213_p2), 916480   ;;  %vm642_vm9 = vcmask (!%p213_p2), 1041408   ;;  %vm638_vm10 = vcmask (!%p213_p2), 293888  }
   0xc   : > { %v274_v12 = vrot.slane (!%p213_p2), %v856_v0, %v273_v10  ;;  %v281_v13 = vrot.slane (!%p213_p2), %v267_v7, %v273_v10  ;;  %vm935_vm11 = vmmov (!%p213_p2), 0   ;;  %vm701_vm12 = vcmask (!%p213_p2), 64512  }
   0xd   : > { %s1080_s22 = smov (!%p242_p3, %s847_s22), 1 }
   0xe   : > { %s870_s25 = sshll.u32 %s1080_s22, 2  ;;  %v283_v15 = vpack.i.b16 %v274_v12, %v274_v12  ;;  %v290_v16 = vpack.i.b16 %v281_v13, %v281_v13  ;;  %v370_v17 = vshrl.u32 %v274_v12, 16  ;;  %v377_v18 = vshrl.u32 %v281_v13, 16  ;;  %s871_s23 = sshll.u32 %s1080_s22, 4 }
   0xf   : > { %s246_s28 = scalar_lea.vmem %s1072_s0, %s870_s25  ;;  %s251_s26 = scalar_lea.vmem %s1078_s6, %s871_s23 }
  0x10   : > { %v255_v20 = vld [vmem:[%s246_s28] sm:$0xf]  ;;  %v288_v21 = vrot.slane %v283_v15, %v287_v14  ;;  %v295_v22 = vrot.slane %v290_v16, %v287_v14  ;;  %v371_v23 = vpack.i.b16 %v370_v17, %v370_v17  ;;  %v378_v24 = vpack.i.b16 %v377_v18, %v377_v18 }
  0x11   : > { %256 = vst [vmem:[#allocation2 + $0x2] sm:$0xf] %v255_v20 }
  0x12   : > { %v298_v25 = vcombine.low %v288_v21, %v295_v22  ;;  %v376_v26 = vrot.slane %v371_v23, %v287_v14  ;;  %v383_v27 = vrot.slane %v378_v24, %v287_v14 }
  0x14   : > { %v305_v28 = vrot.slane %v298_v25, %v988_v19  ;;  %v386_v29 = vcombine.low %v376_v26, %v383_v27 }
  0x16   : > { %429 = vrot.lane.b32.xlu1 %v305_v28, %s926_s29  ;;  %306 = vrot.lane.b32.xlu0 %v305_v28, %s927_s30  ;;  %v393_v30 = vrot.slane %v386_v29, %v988_v19 }
  0x18   : > { %v341_v31 = vld [vmem:[#allocation2] sm:$0x3f] }
  0x19   : > { %v343_v32 = vcombine.low %v341_v31, %v341_v31  ;;  %v996_v33 = vld [vmem:[#allocation2 + $0x2] sm:$0x3f]  ;;  %v357_v35 = vrot.slane %v341_v31, %v988_v19 }
  0x1a   : > { %394 = vrot.lane.b32.xlu0 %v393_v30, %s928_s7  ;;  %475 = vrot.lane.b32.xlu1 %v393_v30, %s929_s8  ;;  %v542_v36 = vcombine.low %v996_v33, %v996_v33  ;;  %v428_v40 = vld [vmem:[#allocation2] sm:$0x3f]  ;;  %v556_v26 = vrot.slane %v996_v33, %v988_v19 }
  0x1b   : > { %v350_v34 = vrot.slane %v343_v32, %v988_v19  ;;  %v258_v42 = vld [vmem:[#allocation2] sm:$0x3f] }
  0x1c   : > { %v549_v37 = vrot.slane %v542_v36, %v988_v19  ;;  %v474_v55 = vld [vmem:[#allocation2 + $0x2] sm:$0x3f] }
  0x1d   : > { %v507_v59 = vld [vmem:[#allocation2 + $0x2] sm:$0x3f] }
  0x1e   : > { %508 = vrot.lane.b32.xlu0 %v305_v28, %s930_s9  ;;  %569 = vrot.lane.b32.xlu1 %v393_v30, %s931_s10  ;;  %v369_v63 = vld [vmem:[#allocation2] sm:$0x3f] }
  0x1f   : > { %v568_v18 = vld [vmem:[#allocation2 + $0x2] sm:$0x3f] }
  0x20   : > { %v857_v21 = vld.sshfl [vmem:[#allocation2 + $0x2] sm:$0x33 pattern:$0x76325410] }
  0x21   : > { %473 = vst [vmem:[#allocation3 + $0x10] sm:$0x33] %v857_v21  ;;  %v607_v31 = vld [vmem:[%s1075_s3] sm:$0xff] }
  0x22   : > { %358 = vrot.lane.b32.xlu0 %v350_v34, %s932_s11  ;;  %360 = vrot.lane.b32.xlu1 %v357_v35, %s932_s11 }
  0x26   : > { %557 = vrot.lane.b32.xlu0 %v549_v37, %s933_s12 }
  0x88   : > { %v430_v38 = vpop.permute.xlu1 %429  ;;  %v307_v39 = vpop.permute.xlu0 %306 }
  0x89   : > { %v431_v41 = vrot.slane %v430_v38, 6  ;;  %v308_v43 = vrot.slane %v307_v39, 6 }
  0x8b   : > { %v433_v44 = vsel %vm432_vm0, %v431_v41, %v430_v38  ;;  %v310_v45 = vsel %vm309_vm1, %v308_v43, %v307_v39 }
  0x8c   : > { %v435_v46 = vmul.bf16 %v433_v44, %v428_v40  ;;  %v312_v47 = vmul.bf16 %v310_v45, %v258_v42  ;;  %v395_v48 = vpop.permute.xlu0 %394  ;;  %v476_v49 = vpop.permute.xlu1 %475 }
  0x8d   : > { %v477_v50 = vrot.slane %v476_v49, 6  ;;  %v396_v54 = vrot.slane %v395_v48, 6 }
  0x8e   : > { %v314_v51 = vcombine.high %v312_v47, %v312_v47  ;;  %v451_v52 = vrot.slane %v435_v46, %v988_v19  ;;  %v321_v53 = vrot.slane %v312_v47, %v988_v19  ;;  %v437_v14 = vcombine.low %v435_v46, %v435_v46 }
  0x8f   : > { %v478_v56 = vsel %vm459_vm2, %v477_v50, %v476_v49  ;;  %v398_v0 = vsel %vm397_vm3, %v396_v54, %v395_v48 }
  0x90   : > { %v509_v57 = vpop.permute.xlu0 %508  ;;  %454 = vrot.lane.b32.xlu1 %v451_v52, %s929_s8  ;;  %329 = vrot.lane.b32.xlu0 %v321_v53, %s931_s10  ;;  %v570_v58 = vpop.permute.xlu1 %569  ;;  %v480_v61 = vmul.bf16 %v478_v56, %v474_v55  ;;  %v328_v62 = vrot.slane %v314_v51, %v988_v19  ;;  %v400_v7 = vmul.bf16 %v398_v0, %v369_v63 }
  0x91   : > { %v510_v60 = vrot.slane %v509_v57, 6  ;;  %v571_v11 = vrot.slane %v570_v58, 6  ;;  %v444_v24 = vrot.slane %v437_v14, %v988_v19 }
  0x92   : > { %v496_v10 = vrot.slane %v480_v61, %v988_v19  ;;  %v402_v15 = vcombine.high %v400_v7, %v400_v7  ;;  %v409_v16 = vrot.slane %v400_v7, %v988_v19  ;;  %v482_v22 = vcombine.low %v480_v61, %v480_v61 }
  0x93   : > { %v511_v1 = vsel %vm424_vm4, %v510_v60, %v509_v57  ;;  %v572_v20 = vsel %vm337_vm7, %v571_v11, %v570_v58 }
  0x94   : > { %v513_v2 = vmul.bf16 %v511_v1, %v507_v59  ;;  %331 = vrot.lane.b32.xlu1 %v328_v62, %s931_s10  ;;  %v359_v3 = vpop.permute.xlu0 %358  ;;  %v361_v4 = vpop.permute.xlu1 %360  ;;  %v574_v23 = vmul.bf16 %v572_v20, %v568_v18  ;;  %v416_v25 = vrot.slane %v402_v15, %v988_v19  ;;  %v489_v28 = vrot.slane %v482_v22, %v988_v19 }
  0x95   : > { %v362_v5 = vrot.slane %v359_v3, 4  ;;  %v363_v6 = vrot.slane %v361_v4, 4 }
  0x96   : > { %v515_v8 = vcombine.high %v513_v2, %v513_v2  ;;  %v522_v9 = vrot.slane %v513_v2, %v988_v19  ;;  %v576_v27 = vcombine.high %v574_v23, %v574_v23  ;;  %v583_v29 = vrot.slane %v574_v23, %v988_v19 }
  0x97   : > { %v364_v12 = vsel %vm335_vm5, %v362_v5, %v363_v6 }
  0x98   : > { %530 = vrot.lane.b32.xlu0 %v522_v9, %s928_s7  ;;  %499 = vrot.lane.b32.xlu1 %v496_v10, %s926_s29  ;;  %v366_v13 = vsel %vm365_vm6, %v359_v3, %v364_v12  ;;  %v529_v17 = vrot.slane %v515_v8, %v988_v19  ;;  %v590_v30 = vrot.slane %v576_v27, %v988_v19  ;;  %v558_v32 = vpop.permute.xlu0 %557 }
  0x99   : > { %368 = vst [vmem:[#allocation3] sm:$0xcc] %v366_v13  ;;  %v561_v55 = vrot.slane %v558_v32, 4 }
  0x9c   : > { %417 = vrot.lane.b32.xlu0 %v409_v16, %s930_s9  ;;  %532 = vrot.lane.b32.xlu1 %v529_v17, %s928_s7  ;;  %v601_v17 = vld [vmem:[%s1074_s2] sm:$0xf] }
  0xa0   : > { %452 = vrot.lane.b32.xlu0 %v444_v24, %s929_s8  ;;  %419 = vrot.lane.b32.xlu1 %v416_v25, %s930_s9 }
  0xa4   : > { %497 = vrot.lane.b32.xlu0 %v489_v28, %s926_s29  ;;  %559 = vrot.lane.b32.xlu1 %v556_v26, %s933_s12 }
  0xa8   : > { %591 = vrot.lane.b32.xlu0 %v583_v29, %s927_s30  ;;  %593 = vrot.lane.b32.xlu1 %v590_v30, %s927_s30  ;;  %v934_v29 = vmov 0.0  }
  0xa9   : > { %874 = vmatprep.subr.mxu1 %v934_v29  ;;  %876 = vmatprep.mubr.msk.f32.mxu1 %vm935_vm11, %v934_v29 }
  0xac   : > { %610 = vperm.xlu0 %900, %v607_v31  }
 0x102   : > { %v455_v33 = vpop.permute.xlu1 %454  ;;  %v330_v34 = vpop.permute.xlu0 %329 }
 0x103   : > { %v333_v36 = vrot.slane %v330_v34, 4  ;;  %v457_v49 = vrot.slane %v455_v33, 4  ;;  %v700_v33 = vld [vmem:[%s1077_s5] sm:$0xff] }
 0x106   : > { %v332_v35 = vpop.permute.xlu1 %331 }
 0x107   : > { %v334_v37 = vrot.slane %v332_v35, 4 }
 0x109   : > { %v336_v38 = vsel %vm335_vm5, %v333_v36, %v334_v37 }
 0x10a   : > { %v338_v39 = vsel %vm337_vm7, %v330_v34, %v336_v38  ;;  %v531_v19 = vpop.permute.xlu0 %530  ;;  %v500_v40 = vpop.permute.xlu1 %499 }
 0x10b   : > { %340 = vst [vmem:[#allocation3] sm:$0x33] %v338_v39  ;;  %v534_v43 = vrot.slane %v531_v19, 4  ;;  %v502_v60 = vrot.slane %v500_v40, 4 }
 0x10e   : > { %v418_v41 = vpop.permute.xlu0 %417  ;;  %v533_v42 = vpop.permute.xlu1 %532 }
 0x10f   : > { %v535_v44 = vrot.slane %v533_v42, 4  ;;  %v421_v50 = vrot.slane %v418_v41, 4 }
 0x111   : > { %v536_v45 = vsel %vm335_vm5, %v534_v43, %v535_v44 }
 0x112   : > { %v537_v46 = vsel %vm397_vm3, %v531_v19, %v536_v45  ;;  %v453_v47 = vpop.permute.xlu0 %452  ;;  %v420_v48 = vpop.permute.xlu1 %419 }
 0x113   : > { %539 = vst [vmem:[#allocation3 + $0x18] sm:$0x33] %v537_v46  ;;  %v456_v51 = vrot.slane %v453_v47, 4  ;;  %v422_v52 = vrot.slane %v420_v48, 4 }
 0x115   : > { %v458_v53 = vsel %vm335_vm5, %v456_v51, %v457_v49  ;;  %v423_v54 = vsel %vm335_vm5, %v421_v50, %v422_v52 }
 0x116   : > { %v460_v56 = vsel %vm459_vm2, %v453_v47, %v458_v53  ;;  %v425_v57 = vsel %vm424_vm4, %v418_v41, %v423_v54  ;;  %v498_v58 = vpop.permute.xlu0 %497  ;;  %v560_v59 = vpop.permute.xlu1 %559 }
 0x117   : > { %462 = vst [vmem:[#allocation3 + $0x8] sm:$0xcc] %v460_v56  ;;  %427 = vst [vmem:[#allocation3 + $0x8] sm:$0x33] %v425_v57  ;;  %v501_v61 = vrot.slane %v498_v58, 4  ;;  %v562_v62 = vrot.slane %v560_v59, 4 }
 0x119   : > { %v503_v63 = vsel %vm335_vm5, %v501_v61, %v502_v60  ;;  %v563_v0 = vsel %vm335_vm5, %v561_v55, %v562_v62 }
 0x11a   : > { %v504_v1 = vsel %vm432_vm0, %v498_v58, %v503_v63  ;;  %v565_v2 = vsel %vm564_vm8, %v558_v32, %v563_v0  ;;  %v592_v3 = vpop.permute.xlu0 %591  ;;  %v594_v4 = vpop.permute.xlu1 %593  ;;  %v699_v32 = vld [vmem:[%s1076_s4] sm:$0xff] }
 0x11b   : > { %506 = vst [vmem:[#allocation3 + $0x10] sm:$0xcc] %v504_v1  ;;  %567 = vst [vmem:[#allocation3 + $0x18] sm:$0xcc] %v565_v2  ;;  %v595_v5 = vrot.slane %v592_v3, 4  ;;  %v596_v6 = vrot.slane %v594_v4, 4 }
 0x11d   : > { %v597_v7 = vsel %vm335_vm5, %v595_v5, %v596_v6 }
 0x11e   : > { %v598_v8 = vsel %vm309_vm1, %v592_v3, %v597_v7  ;;  %v903_v9 = vld [vmem:[#allocation3 + $0x4] ss:$8 sps:$4 sm:$0xff]   ;;  %v905_v10 = vld [vmem:[#allocation3] ss:$8 sps:$4 sm:$0xff]  }
 0x11f   : > { %600 = vst [vmem:[#allocation3 + $0x20] sm:$0x33] %v598_v8  ;;  %649 = vmatprep.subr.bf16.mxu0 %v903_v9 }
 0x120   : > { %650 = vmatpush1.bf16.msra.mxu0 %v905_v10 }
 0x122   : > { %v906_v11 = vld [vmem:[#allocation3 + $0x14] ss:$8 sps:$4 sm:$0xff]   ;;  %v908_v12 = vld [vmem:[#allocation3 + $0x10] ss:$8 sps:$4 sm:$0xff]  }
 0x123   : > { %651 = vmatprep.subr.bf16.mxu0 %v906_v11 }
 0x124   : > { %652 = vmatpush1.bf16.msra.mxu0 %v908_v12 }
 0x126   : > { %v606_v13 = vld [vmem:[#allocation3 + $0x20] sm:$0x33] }
 0x127   : > { %v863_v14 = vcombine.high %v606_v13, %v606_v13  ;;  %v862_v15 = vcombine.low %v606_v13, %v606_v13 }
 0x129   : > { %864 = vmatprep.subr.msk.bf16.mxu0 %vm642_vm9, %v863_v14  ;;  %v644_v16 = vsel %vm642_vm9, %v862_v15, 0 }
 0x12a   : > { %654 = vmatpush1.bf16.msra.mxu0 %v644_v16 }
 0x12b   : > { %v611_v18 = vpop.permute.xlu0 %610 }
 0x12d   : > { %865 = vmatmul.mubr.msk.bf16.vlgmr.msra.gmra.mrb[0].mxu0 %vm638_vm10, %v601_v17 }
 0x200   : > { %v683_v20 = vpop.f32.mrb[0].mxu0 }
 0x201   : > { %v684_v21 = vadd.f32 %v683_v20, %v611_v18  ;;  %v685_v22 = vpop.f32.mrb[1].mxu0 }
 0x202   : > { %v686_v23 = vadd.f32 %v685_v22, %v611_v18  ;;  %v687_v24 = vpop.f32.mrb[2].mxu0 }
 0x203   : > { %v690_v25 = vmax.f32 %v684_v21, 0.0  ;;  %v688_v26 = vpop.f32.mrb[3].mxu0 }
 0x204   : > { %v691_v27 = vmax.f32 %v686_v23, 0.0 }
 0x206   : > { %v694_v28 = vadd.f32 %v691_v27, %v690_v25 }
 0x208   : > { %695 = vadd.xlane.f32.xlu1 %v694_v28 }
 0x295   : > { %v696_v30 = vpop.xlane.xlu1 %695 }
 0x296   : > { %v698_v31 = vmul.f32 0.00390625, %v696_v30 }
 0x298   : > { %875 = vmatpush3.msra.mxu1 %v698_v31 }
 0x299   : > { %877 = vmatmul.mubr.msk.f32.vlgmr.msra.gmra.mrb[0].mxu1 %vm701_vm12, %v699_v32 }
 0x36c   : > { %v771_v34 = vpop.f32.mrb[0].mxu1 }
 0x36d   : > { %v772_v35 = vadd.f32 %v771_v34, %v700_v33  ;;  %v878_v36 = vpop.f32.mrb[1].mxu1 }
 0x36f   : > { %v867_v37 = vmul.f32 -1.442695, %v772_v35 }
 0x371   : > { %911 = vpow2.f32 %v867_v37 }
 0x37b   : > { %v912_v38 = vpop.eup %911 }
 0x37c   : > { %v778_v39 = vadd.f32 1.0, %v912_v38 }
 0x37e   : > { %913 = vrcp.f32 %v778_v39 }
 0x388   : > { %v914_v19 = vpop.eup %913 }
 0x389   : > { %785 = vperm.xlu0 %900, %v914_v19  }
 0x408   : > { %v786_v40 = vpop.permute.xlu0 %785 }
 0x409   : > { %v788_v41 = vmul.f32 %v786_v40, %v690_v25  ;;  %v789_v42 = vmul.f32 %v786_v40, %v691_v27 }
 0x40b   : > { %790 = vst [vmem:[%s251_s26] sm:$0xff] %v788_v41  ;;  %791 = vst [vmem:[%s251_s26 + $0x8] sm:$0xff] %v789_v42 }
 0x40c PF: > { %s16_s21 = sadd.s32 1, %s921_s21  }
 0x40d   : > { %p13_p4 = scmp.ge.s32.totalorder %s16_s21, 4  }
 0x40f   :  { %15 = sbr.rel (!%p13_p4) target bundleno = 1 (0x1), region = 74 }

</bundles_post_ra>
